<compile_context>
chip_gen: v7x
topology: tpu7x:2x2x1
jax: 0.10.0
libtpu: 0.0.40
codegen_flags: <defaults>
</compile_context>

<pallas_src>
import jax
import jax.numpy as jnp
from jax.experimental import pallas as pl
from jax.experimental.pallas import tpu as pltpu


def _deconv_row_kernel(x0_ref, x1_ref, x2_ref, w_ref, b_ref, o_ref):
    # x{0,1,2}_ref: (1, 1, W+2, Cin)   padded input rows m, m+1, m+2
    # w_ref       : (9, Cin, 4*Cout)   packed 3x3 tap weights (tap = 3*r + s), resident
    # b_ref       : (1, 4*Cout)        bias replicated per parity class, resident
    # o_ref       : (1, 1, W, 4*Cout)  one output row, lane axis = 4*Cout
    w_out = o_ref.shape[2]
    c4 = o_ref.shape[3]

    acc = jnp.zeros((w_out, c4), jnp.float32)
    rows = (x0_ref[...], x1_ref[...], x2_ref[...])
    for r in range(3):
        row = rows[r][0, 0].astype(jnp.float32)            # (W+2, Cin)
        for s in range(3):
            lhs = row[s:s + w_out, :]                       # (W, Cin) static slice
            rhs = w_ref[3 * r + s].astype(jnp.float32)      # (Cin, 4*Cout)
            acc = acc + jnp.dot(lhs, rhs, preferred_element_type=jnp.float32)

    acc = acc + b_ref[...].astype(jnp.float32)
    o_ref[0, 0] = acc.astype(o_ref.dtype)


def _pack_weights(wt):
    """(Cin, Cout, 5, 5) ConvTranspose2d weight -> (9, Cin, 4*Cout) conv taps."""
    cin, cout = wt.shape[0], wt.shape[1]
    wb = jnp.zeros((3, 3, cin, 2, 2, cout), wt.dtype)
    for r in range(3):
        for a in range(2):
            kh = 2 * (2 - r) + a
            if kh > 4:
                continue
            for s in range(3):
                for b in range(2):
                    kw = 2 * (2 - s) + b
                    if kw > 4:
                        continue
                    wb = wb.at[r, s, :, a, b, :].set(wt[:, :, kh, kw])
    return wb.reshape(9, cin, 4 * cout)


def conv_transpose2d_same(x, wt, bias):
    """x: (N, Cin, H, W); wt: (Cin, Cout, 5, 5); bias: (Cout,) -> (N, Cout, 2H, 2W)."""
    n, cin, h, w = x.shape
    cout = wt.shape[1]
    c4 = 4 * cout

    x_nhwc = jnp.transpose(x, (0, 2, 3, 1))
    x_pad = jnp.pad(x_nhwc, ((0, 0), (1, 1), (1, 1), (0, 0)))   # (N, H+2, W+2, Cin)
    w_big = _pack_weights(wt)                                    # (9, Cin, 4*Cout)
    b_big = jnp.tile(bias, 4).reshape(1, c4)                     # (1, 4*Cout)

    def row_spec(dr):
        return pl.BlockSpec((1, 1, w + 2, cin),
                            lambda ni, mi, _dr=dr: (ni, mi + _dr, 0, 0))

    y_all = pl.pallas_call(
        _deconv_row_kernel,
        out_shape=jax.ShapeDtypeStruct((n, h, w, c4), x.dtype),
        grid=(n, h),
        in_specs=[
            row_spec(0), row_spec(1), row_spec(2),
            pl.BlockSpec((9, cin, c4), lambda ni, mi: (0, 0, 0)),   # resident weights
            pl.BlockSpec((1, c4), lambda ni, mi: (0, 0)),           # resident bias
        ],
        out_specs=pl.BlockSpec((1, 1, w, c4), lambda ni, mi: (ni, mi, 0, 0)),
        compiler_params=pltpu.CompilerParams(
            dimension_semantics=("parallel", "parallel")),
    )(x_pad, x_pad, x_pad, w_big, b_big)

    # Pixel-shuffle: (N, H, W, 2, 2, Cout) -> (N, 2H, 2W, Cout) -> NCHW.
    y = y_all.reshape(n, h, w, 2, 2, cout)
    y = jnp.transpose(y, (0, 1, 3, 2, 4, 5)).reshape(n, 2 * h, 2 * w, cout)
    return jnp.transpose(y, (0, 3, 1, 2))


if __name__ == "__main__":
    N, Cin, Cout, H, W = 2, 4, 4, 16, 16

    key = jax.random.PRNGKey(0)
    kx, kwt, kb = jax.random.split(key, 3)

    x = jax.random.normal(kx, (N, Cin, H, W), dtype=jnp.float32)
    fan = Cin * 5 * 5
    bound = 1.0 / (fan ** 0.5)
    wt = jax.random.uniform(kwt, (Cin, Cout, 5, 5),
                            minval=-bound, maxval=bound, dtype=jnp.float32)
    bias = jax.random.uniform(kb, (Cout,),
                              minval=-bound, maxval=bound, dtype=jnp.float32)

    out = conv_transpose2d_same(x, wt, bias)
    out = jax.block_until_ready(out)

    # Independent pure-JAX reference, straight from the ConvTranspose2d definition
    # (scatter-add of every kernel tap, then crop by padding, add bias).
    stride, pad, K = 2, 2, 5
    OH, OW = 2 * H, 2 * W
    canvas = jnp.zeros((N, Cout, (H - 1) * stride + K, (W - 1) * stride + K),
                       jnp.float32)
    for kh in range(K):
        for kw in range(K):
            contrib = jnp.einsum('nihw,io->nohw', x, wt[:, :, kh, kw])
            canvas = canvas.at[:, :, kh:kh + stride * H:stride,
                               kw:kw + stride * W:stride].add(contrib)
    ref = canvas[:, :, pad:pad + OH, pad:pad + OW] + bias[None, :, None, None]

    assert out.shape == (N, Cout, OH, OW), out.shape
    max_err = float(jnp.max(jnp.abs(out - ref)))
    assert jnp.allclose(out, ref, atol=1e-4, rtol=1e-4), max_err

    print("KERNEL_OK")
</pallas_src>

<mosaic_0001>
module attributes {stable_mosaic.version = 11 : i64} {
  func.func @_deconv_row_kernel(%arg0: i32, %arg1: i32, %arg2: memref<1x1x18x4xf32, #tpu.memory_space<vmem>>, %arg3: memref<1x1x18x4xf32, #tpu.memory_space<vmem>>, %arg4: memref<1x1x18x4xf32, #tpu.memory_space<vmem>>, %arg5: memref<9x4x16xf32, #tpu.memory_space<vmem>>, %arg6: memref<1x16xf32, #tpu.memory_space<vmem>>, %arg7: memref<1x1x16x16xf32, #tpu.memory_space<vmem>>) attributes {dimension_semantics = [#tpu.dimension_semantics<parallel>, #tpu.dimension_semantics<parallel>], iteration_bounds = array<i64: 2, 16>, scalar_prefetch = 0 : i64, scratch_operands = 0 : i64, tpu.core_type = #tpu.core_type<tc>, window_params = [{transform_indices = @transform_0, window_bounds = array<i64: 1, 1, 18, 4>}, {transform_indices = @transform_1, window_bounds = array<i64: 1, 1, 18, 4>}, {transform_indices = @transform_2, window_bounds = array<i64: 1, 1, 18, 4>}, {pipeline_mode = #tpu.pipeline_mode<synchronous>, transform_indices = @transform_3, window_bounds = array<i64: 9, 4, 16>}, {pipeline_mode = #tpu.pipeline_mode<synchronous>, transform_indices = @transform_4, window_bounds = array<i64: 1, 16>}, {transform_indices = @transform_5, window_bounds = array<i64: 1, 1, 16, 16>}]} {
    %cst = arith.constant 0.000000e+00 : f32
    %0 = vector.broadcast %cst : f32 to vector<16x16xf32>
    %c0 = arith.constant 0 : index
    %c0_0 = arith.constant 0 : index
    %c0_1 = arith.constant 0 : index
    %c0_2 = arith.constant 0 : index
    %1 = vector.load %arg2[%c0, %c0_0, %c0_1, %c0_2] : memref<1x1x18x4xf32, #tpu.memory_space<vmem>>, vector<1x1x18x4xf32>
    %c0_3 = arith.constant 0 : index
    %c0_4 = arith.constant 0 : index
    %c0_5 = arith.constant 0 : index
    %c0_6 = arith.constant 0 : index
    %2 = vector.load %arg3[%c0_3, %c0_4, %c0_5, %c0_6] : memref<1x1x18x4xf32, #tpu.memory_space<vmem>>, vector<1x1x18x4xf32>
    %c0_7 = arith.constant 0 : index
    %c0_8 = arith.constant 0 : index
    %c0_9 = arith.constant 0 : index
    %c0_10 = arith.constant 0 : index
    %3 = vector.load %arg4[%c0_7, %c0_8, %c0_9, %c0_10] : memref<1x1x18x4xf32, #tpu.memory_space<vmem>>, vector<1x1x18x4xf32>
    %4 = vector.shape_cast %1 : vector<1x1x18x4xf32> to vector<18x4xf32>
    %5 = vector.extract_strided_slice %4 {offsets = [0, 0], sizes = [16, 4], strides = [1, 1]} : vector<18x4xf32> to vector<16x4xf32>
    %c0_11 = arith.constant 0 : index
    %c0_12 = arith.constant 0 : index
    %c0_13 = arith.constant 0 : index
    %6 = vector.load %arg5[%c0_11, %c0_12, %c0_13] : memref<9x4x16xf32, #tpu.memory_space<vmem>>, vector<1x4x16xf32>
    %7 = vector.shape_cast %6 : vector<1x4x16xf32> to vector<4x16xf32>
    %cst_14 = arith.constant dense<0.000000e+00> : vector<16x16xf32>
    %8 = tpu.matmul %5, %7, %cst_14 {dimension_numbers = #tpu.dot_dimension_numbers<[1], [0], [0], [1], [0, 0, 1, 1], [], []>} : vector<16x4xf32>, vector<4x16xf32>, vector<16x16xf32> -> vector<16x16xf32>
    %9 = arith.addf %0, %8 : vector<16x16xf32>
    %10 = vector.extract_strided_slice %4 {offsets = [1, 0], sizes = [16, 4], strides = [1, 1]} : vector<18x4xf32> to vector<16x4xf32>
    %c1 = arith.constant 1 : index
    %c0_15 = arith.constant 0 : index
    %c0_16 = arith.constant 0 : index
    %11 = vector.load %arg5[%c1, %c0_15, %c0_16] : memref<9x4x16xf32, #tpu.memory_space<vmem>>, vector<1x4x16xf32>
    %12 = vector.shape_cast %11 : vector<1x4x16xf32> to vector<4x16xf32>
    %cst_17 = arith.constant dense<0.000000e+00> : vector<16x16xf32>
    %13 = tpu.matmul %10, %12, %cst_17 {dimension_numbers = #tpu.dot_dimension_numbers<[1], [0], [0], [1], [0, 0, 1, 1], [], []>} : vector<16x4xf32>, vector<4x16xf32>, vector<16x16xf32> -> vector<16x16xf32>
    %14 = arith.addf %9, %13 : vector<16x16xf32>
    %15 = vector.extract_strided_slice %4 {offsets = [2, 0], sizes = [16, 4], strides = [1, 1]} : vector<18x4xf32> to vector<16x4xf32>
    %c2 = arith.constant 2 : index
    %c0_18 = arith.constant 0 : index
    %c0_19 = arith.constant 0 : index
    %16 = vector.load %arg5[%c2, %c0_18, %c0_19] : memref<9x4x16xf32, #tpu.memory_space<vmem>>, vector<1x4x16xf32>
    %17 = vector.shape_cast %16 : vector<1x4x16xf32> to vector<4x16xf32>
    %cst_20 = arith.constant dense<0.000000e+00> : vector<16x16xf32>
    %18 = tpu.matmul %15, %17, %cst_20 {dimension_numbers = #tpu.dot_dimension_numbers<[1], [0], [0], [1], [0, 0, 1, 1], [], []>} : vector<16x4xf32>, vector<4x16xf32>, vector<16x16xf32> -> vector<16x16xf32>
    %19 = arith.addf %14, %18 : vector<16x16xf32>
    %20 = vector.shape_cast %2 : vector<1x1x18x4xf32> to vector<18x4xf32>
    %21 = vector.extract_strided_slice %20 {offsets = [0, 0], sizes = [16, 4], strides = [1, 1]} : vector<18x4xf32> to vector<16x4xf32>
    %c3 = arith.constant 3 : index
    %c0_21 = arith.constant 0 : index
    %c0_22 = arith.constant 0 : index
    %22 = vector.load %arg5[%c3, %c0_21, %c0_22] : memref<9x4x16xf32, #tpu.memory_space<vmem>>, vector<1x4x16xf32>
    %23 = vector.shape_cast %22 : vector<1x4x16xf32> to vector<4x16xf32>
    %cst_23 = arith.constant dense<0.000000e+00> : vector<16x16xf32>
    %24 = tpu.matmul %21, %23, %cst_23 {dimension_numbers = #tpu.dot_dimension_numbers<[1], [0], [0], [1], [0, 0, 1, 1], [], []>} : vector<16x4xf32>, vector<4x16xf32>, vector<16x16xf32> -> vector<16x16xf32>
    %25 = arith.addf %19, %24 : vector<16x16xf32>
    %26 = vector.extract_strided_slice %20 {offsets = [1, 0], sizes = [16, 4], strides = [1, 1]} : vector<18x4xf32> to vector<16x4xf32>
    %c4 = arith.constant 4 : index
    %c0_24 = arith.constant 0 : index
    %c0_25 = arith.constant 0 : index
    %27 = vector.load %arg5[%c4, %c0_24, %c0_25] : memref<9x4x16xf32, #tpu.memory_space<vmem>>, vector<1x4x16xf32>
    %28 = vector.shape_cast %27 : vector<1x4x16xf32> to vector<4x16xf32>
    %cst_26 = arith.constant dense<0.000000e+00> : vector<16x16xf32>
    %29 = tpu.matmul %26, %28, %cst_26 {dimension_numbers = #tpu.dot_dimension_numbers<[1], [0], [0], [1], [0, 0, 1, 1], [], []>} : vector<16x4xf32>, vector<4x16xf32>, vector<16x16xf32> -> vector<16x16xf32>
    %30 = arith.addf %25, %29 : vector<16x16xf32>
    %31 = vector.extract_strided_slice %20 {offsets = [2, 0], sizes = [16, 4], strides = [1, 1]} : vector<18x4xf32> to vector<16x4xf32>
    %c5 = arith.constant 5 : index
    %c0_27 = arith.constant 0 : index
    %c0_28 = arith.constant 0 : index
    %32 = vector.load %arg5[%c5, %c0_27, %c0_28] : memref<9x4x16xf32, #tpu.memory_space<vmem>>, vector<1x4x16xf32>
    %33 = vector.shape_cast %32 : vector<1x4x16xf32> to vector<4x16xf32>
    %cst_29 = arith.constant dense<0.000000e+00> : vector<16x16xf32>
    %34 = tpu.matmul %31, %33, %cst_29 {dimension_numbers = #tpu.dot_dimension_numbers<[1], [0], [0], [1], [0, 0, 1, 1], [], []>} : vector<16x4xf32>, vector<4x16xf32>, vector<16x16xf32> -> vector<16x16xf32>
    %35 = arith.addf %30, %34 : vector<16x16xf32>
    %36 = vector.shape_cast %3 : vector<1x1x18x4xf32> to vector<18x4xf32>
    %37 = vector.extract_strided_slice %36 {offsets = [0, 0], sizes = [16, 4], strides = [1, 1]} : vector<18x4xf32> to vector<16x4xf32>
    %c6 = arith.constant 6 : index
    %c0_30 = arith.constant 0 : index
    %c0_31 = arith.constant 0 : index
    %38 = vector.load %arg5[%c6, %c0_30, %c0_31] : memref<9x4x16xf32, #tpu.memory_space<vmem>>, vector<1x4x16xf32>
    %39 = vector.shape_cast %38 : vector<1x4x16xf32> to vector<4x16xf32>
    %cst_32 = arith.constant dense<0.000000e+00> : vector<16x16xf32>
    %40 = tpu.matmul %37, %39, %cst_32 {dimension_numbers = #tpu.dot_dimension_numbers<[1], [0], [0], [1], [0, 0, 1, 1], [], []>} : vector<16x4xf32>, vector<4x16xf32>, vector<16x16xf32> -> vector<16x16xf32>
    %41 = arith.addf %35, %40 : vector<16x16xf32>
    %42 = vector.extract_strided_slice %36 {offsets = [1, 0], sizes = [16, 4], strides = [1, 1]} : vector<18x4xf32> to vector<16x4xf32>
    %c7 = arith.constant 7 : index
    %c0_33 = arith.constant 0 : index
    %c0_34 = arith.constant 0 : index
    %43 = vector.load %arg5[%c7, %c0_33, %c0_34] : memref<9x4x16xf32, #tpu.memory_space<vmem>>, vector<1x4x16xf32>
    %44 = vector.shape_cast %43 : vector<1x4x16xf32> to vector<4x16xf32>
    %cst_35 = arith.constant dense<0.000000e+00> : vector<16x16xf32>
    %45 = tpu.matmul %42, %44, %cst_35 {dimension_numbers = #tpu.dot_dimension_numbers<[1], [0], [0], [1], [0, 0, 1, 1], [], []>} : vector<16x4xf32>, vector<4x16xf32>, vector<16x16xf32> -> vector<16x16xf32>
    %46 = arith.addf %41, %45 : vector<16x16xf32>
    %47 = vector.extract_strided_slice %36 {offsets = [2, 0], sizes = [16, 4], strides = [1, 1]} : vector<18x4xf32> to vector<16x4xf32>
    %c8 = arith.constant 8 : index
    %c0_36 = arith.constant 0 : index
    %c0_37 = arith.constant 0 : index
    %48 = vector.load %arg5[%c8, %c0_36, %c0_37] : memref<9x4x16xf32, #tpu.memory_space<vmem>>, vector<1x4x16xf32>
    %49 = vector.shape_cast %48 : vector<1x4x16xf32> to vector<4x16xf32>
    %cst_38 = arith.constant dense<0.000000e+00> : vector<16x16xf32>
    %50 = tpu.matmul %47, %49, %cst_38 {dimension_numbers = #tpu.dot_dimension_numbers<[1], [0], [0], [1], [0, 0, 1, 1], [], []>} : vector<16x4xf32>, vector<4x16xf32>, vector<16x16xf32> -> vector<16x16xf32>
    %51 = arith.addf %46, %50 : vector<16x16xf32>
    %c0_39 = arith.constant 0 : index
    %c0_40 = arith.constant 0 : index
    %52 = vector.load %arg6[%c0_39, %c0_40] : memref<1x16xf32, #tpu.memory_space<vmem>>, vector<1x16xf32>
    %53 = vector.broadcast %52 : vector<1x16xf32> to vector<16x16xf32>
    %54 = arith.addf %51, %53 : vector<16x16xf32>
    %c0_41 = arith.constant 0 : index
    %c0_42 = arith.constant 0 : index
    %c0_43 = arith.constant 0 : index
    %c0_44 = arith.constant 0 : index
    %55 = vector.load %arg7[%c0_41, %c0_42, %c0_43, %c0_44] : memref<1x1x16x16xf32, #tpu.memory_space<vmem>>, vector<1x1x16x16xf32>
    %56 = vector.shape_cast %55 : vector<1x1x16x16xf32> to vector<16x16xf32>
    %57 = vector.shape_cast %54 : vector<16x16xf32> to vector<1x1x16x16xf32>
    tpu.vector_store %arg7[%c0_41, %c0_42, %c0_43, %c0_44], %57 {strides = array<i32>} : memref<1x1x16x16xf32, #tpu.memory_space<vmem>>, vector<1x1x16x16xf32>,
    return
  }
  func.func @transform_0(%arg0: i32, %arg1: i32) -> (i32, i32, i32, i32) {
    %c0_i32 = arith.constant 0 : i32
    %0 = arith.addi %arg1, %c0_i32 : i32
    %c0_i32_0 = arith.constant 0 : i32
    %c0_i32_1 = arith.constant 0 : i32
    %c0_i32_2 = arith.constant 0 : i32
    return %arg0, %0, %c0_i32_0, %c0_i32_1 : i32, i32, i32, i32
  }
  func.func @transform_1(%arg0: i32, %arg1: i32) -> (i32, i32, i32, i32) {
    %c1_i32 = arith.constant 1 : i32
    %0 = arith.addi %arg1, %c1_i32 : i32
    %c0_i32 = arith.constant 0 : i32
    %c0_i32_0 = arith.constant 0 : i32
    %c0_i32_1 = arith.constant 0 : i32
    return %arg0, %0, %c0_i32, %c0_i32_0 : i32, i32, i32, i32
  }
  func.func @transform_2(%arg0: i32, %arg1: i32) -> (i32, i32, i32, i32) {
    %c2_i32 = arith.constant 2 : i32
    %0 = arith.addi %arg1, %c2_i32 : i32
    %c0_i32 = arith.constant 0 : i32
    %c0_i32_0 = arith.constant 0 : i32
    %c0_i32_1 = arith.constant 0 : i32
    return %arg0, %0, %c0_i32, %c0_i32_0 : i32, i32, i32, i32
  }
  func.func @transform_3(%arg0: i32, %arg1: i32) -> (i32, i32, i32) {
    %c0_i32 = arith.constant 0 : i32
    %c0_i32_0 = arith.constant 0 : i32
    %c0_i32_1 = arith.constant 0 : i32
    %c0_i32_2 = arith.constant 0 : i32
    return %c0_i32, %c0_i32_0, %c0_i32_1 : i32, i32, i32
  }
  func.func @transform_4(%arg0: i32, %arg1: i32) -> (i32, i32) {
    %c0_i32 = arith.constant 0 : i32
    %c0_i32_0 = arith.constant 0 : i32
    %c0_i32_1 = arith.constant 0 : i32
    return %c0_i32, %c0_i32_0 : i32, i32
  }
  func.func @transform_5(%arg0: i32, %arg1: i32) -> (i32, i32, i32, i32) {
    %c0_i32 = arith.constant 0 : i32
    %c0_i32_0 = arith.constant 0 : i32
    %c0_i32_1 = arith.constant 0 : i32
    return %arg0, %arg1, %c0_i32, %c0_i32_0 : i32, i32, i32, i32
  }
}

</mosaic_0001>

<bundles_post_ra>
// kernel: tpu_custom_call.1
= control target key start
LH: loop header
LB: loop body
LE: loop exit
PB: predicated region body
PF: predicated region fallthrough
CT: control target
= control target key end

     0   :  { %10 = vsyncpa [#allocation3], 0  ;;  %s1891_s0 = inlined_call_operand.vmem [shape: f32[2,18,18,4], index: 0, kind: input, shape index: {}]   ;;  %s1892_s1 = inlined_call_operand.vmem [shape: f32[2,18,18,4], index: 1, kind: input, shape index: {}]   ;;  %s1893_s2 = inlined_call_operand.vmem [shape: f32[2,18,18,4], index: 2, kind: input, shape index: {}]   ;;  %s1894_s3 = inlined_call_operand.vmem [shape: f32[9,4,16], index: 3, kind: input, shape index: {}]   ;;  %s1895_s4 = inlined_call_operand.vmem [shape: f32[1,16], index: 4, kind: input, shape index: {}]   ;;  %s1896_s5 = inlined_call_operand.hbm [shape: f32[2,16,16,16], index: 5, kind: output, shape index: {}]  }
   0x1   :  { %12 = vsyncpa [#allocation3 + $0x1], 0  ;;  %s1654_s18 = smov 0   ;;  %s1656_s19 = smov 0  }
   0x2   :  { %s1658_s20 = smov 0   ;;  %s1660_s21 = smov 0  }
   0x3   :  { %s1662_s22 = smov 0   ;;  %s1664_s23 = smov 0  }
   0x4   :  { %s1666_s24 = smov 0   ;;  %s1668_s25 = smov 0  }
   0x5 LB: > { %s1309_s26 = sadd.s32 4294967295, %s1619_s25   ;;  %s1310_s27 = sadd.s32 4294967294, %s1619_s25   ;;  %s1619_s25 = sphi %s1668_s25, %s18_s25   ;;  %s1615_s24 = sphi %s1666_s24, %s1909_s24   ;;  %s1611_s23 = sphi %s1664_s23, %s1908_s23   ;;  %s1607_s22 = sphi %s1662_s22, %s1907_s22   ;;  %s1603_s21 = sphi %s1660_s21, %s1906_s21   ;;  %s1599_s20 = sphi %s1658_s20, %s1905_s20   ;;  %s1595_s19 = sphi %s1656_s19, %s1904_s19   ;;  %s1591_s18 = sphi %s1654_s18, %s1903_s18  }
   0x6   : > { %s27_s28 = sadd.s32 1, %s1611_s23  ;;  %s30_s29 = sadd.s32 1, %s1615_s24 }
   0x7   : > { %p28_p0 = scmp.ge.s32.totalorder %s27_s28, 16  ;;  %p179_p1 = scmp.ne.s32.totalorder %s1599_s20, %s1595_s19 }
   0x8   : > { %p180_p2 = scmp.eq.s32.totalorder %s1309_s26, 31  ;;  %p185_p5 = scmp.ne.s32.totalorder %s1595_s19, %s1591_s18 }
   0x9   : > { %s1911_s28 = smov (%p28_p0, %s27_s28), 0  ;;  %s1913_s29 = smov (!%p28_p0, %s30_s29), %s1615_s24 }
   0xa   : > { %s165_s30 = ssub.s32 %s1611_s23, %s1911_s28  ;;  %p1705_p3 = por %p180_p2, %p179_p1 }
   0xb   : > { %p32_p4 = scmp.ge.s32.totalorder %s1913_s29, 2  ;;  %p186_p6 = scmp.eq.s32.totalorder %s1310_s27, 31 }
   0xc   : > { %p1313_p7 = scmp.ge.s32.totalorder %s1619_s25, 1  ;;  %p250_p9 = scmp.lt.s32.totalorder %s1619_s25, 33 }
   0xd   : > { %s1915_s29 = smov (%p32_p4, %s1913_s29), 0  ;;  %p1714_p8 = por %p186_p6, %p185_p5 }
   0xe   : > { %1899 = sst [smem:[#allocation5_spill]] %s1915_s29  ;;  %s164_s8 = ssub.s32 %s1615_s24, %s1915_s29 }
   0xf   : > { %s169_s9 = sadd.s32 1, %s1599_s20  ;;  %s166_s10 = sor.u32 %s165_s30, %s164_s8 }
  0x10   : > { %p251_p10 = pnand %p1313_p7, %p250_p9  ;;  %p167_p11 = scmp.eq.s32.totalorder %s166_s10, 0 }
  0x11   : > { %v1318_v0 = vld [vmem:[%s1894_s3 + $0x4] sm:$0xf] (!%p251_p10)  ;;  %vm359_vm0 = vcmask (!%p251_p10), 1043456   ;;  %v1333_v1 = vld [vmem:[%s1894_s3 + $0x10] sm:$0xf] (!%p251_p10)  ;;  %p302_p12 = scmp.lt.s32.totalorder (!%p251_p10), %s1607_s22, 1 }
  0x12   : > { %s1723_s11 = scalar_select %p167_p11, %s1599_s20, %s169_s9  }
  0x13   : > { %254 = sbr.rel (%p251_p10) target bundleno = 305 (0x131), region = 40  ;;  %1387 = vmatprep.subr.msk.mxu1 (!%p251_p10), %vm359_vm0, %v1318_v0  ;;  %1407 = vmatprep.subr.msk.mxu0 (!%p251_p10), %vm359_vm0, %v1333_v1  ;;  %p304_p13 = scmp.lt.s32.totalorder (!%p251_p10), %s1603_s21, 17  ;;  %v1337_v2 = vld [vmem:[%s1894_s3 + $0x14] sm:$0xf] (!%p251_p10)  ;;  %v342_v3 = vld [vmem:[%s1894_s3] sm:$0xf] (!%p251_p10) }
  0x14   : > { %s311_s16 = sadd.s32 (!%p251_p10), 1, %s1603_s21  ;;  %1388 = vmatpush3.msk.msra.mxu1 (!%p251_p10), %vm359_vm0, %v1318_v0  ;;  %1408 = vmatpush3.msk.msra.mxu0 (!%p251_p10), %vm359_vm0, %v1333_v1  ;;  %s322_s13 = sadd.s32 (!%p251_p10), 2, %s1603_s21  ;;  %vm348_vm1 = vcmask (!%p251_p10), 1046528   ;;  %vm354_vm2 = vcmask (!%p251_p10), 31744   ;;  %vm522_vm3 = vcmask (!%p251_p10), 1045504   ;;  %vm1163_vm4 = vcmask (!%p251_p10), 130048  }
  0x15   : > { %1412 = vmatprep.subr.msk.mxu0 (!%p251_p10), %vm359_vm0, %v1337_v2  ;;  %1392 = vmatprep.subr.msk.mxu1 (!%p251_p10), %vm359_vm0, %v342_v3  ;;  %p314_p0 = scmp.lt.s32.totalorder (!%p251_p10), %s311_s16, 17  ;;  %p1755_p1 = scmp.lt.s32.totalorder (!%p251_p10), %s322_s13, 17  ;;  %v1325_v18 = vld [vmem:[%s1894_s3 + $0x8] sm:$0xf] (!%p251_p10)  ;;  %v1341_v24 = vld [vmem:[%s1894_s3 + $0x18] sm:$0xf] (!%p251_p10) }
  0x16   : > { %v1329_v29 = vld [vmem:[%s1894_s3 + $0xc] sm:$0xf] (!%p251_p10)  ;;  %v1345_v33 = vld [vmem:[%s1894_s3 + $0x1c] sm:$0xf] (!%p251_p10)  ;;  %v1349_v40 = vld [vmem:[%s1894_s3 + $0x20] sm:$0xf] (!%p251_p10) }
  0x17   : > { %s299_s26 = sand.u32 (!%p251_p10), 1, %s1595_s19   ;;  %v1353_v51 = vld [vmem:[%s1895_s4] ss:$0 sm:$0xff] (!%p251_p10) }
  0x1a   : > { %s303_s27 = scalar_select %p302_p12, %s1607_s22, 1 }
  0x1b   : > { %s305_s9 = scalar_select %p304_p13, %s1603_s21, 17 }
  0x1c   : > { %s1748_s10 = smul.u32 54, %s303_s27  ;;  %s1917_s16 = smov (!%p314_p0, %s311_s16), 17 }
  0x1d   : > { %s1448_s12 = smul.u32 3, %s305_s9  ;;  %s1919_s13 = smov (!%p1755_p1, %s322_s13), 17 }
  0x1e   : > { %s1450_s17 = smul.u32 3, %s1917_s16 }
  0x1f   : > { %s308_s14 = sadd.s32 %s1748_s10, %s1448_s12 }
  0x20   : > { %s1315_s15 = sshll.u32 %s308_s14, 3  ;;  %s318_s27 = sadd.s32 %s1450_s17, %s1748_s10 }
  0x21   : > { %s310_s30 = scalar_lea.vmem %s1891_s0, %s1315_s15  ;;  %s1316_s9 = sshll.u32 %s318_s27, 3 }
  0x22   : > { %v333_v4 = vld [vmem:[%s310_s30] sm:$0xff]  ;;  %v334_v5 = vld [vmem:[%s310_s30 + $0x8] sm:$0xff]  ;;  %v335_v6 = vld [vmem:[%s310_s30 + $0x10] sm:$0x3]  ;;  %s320_s29 = scalar_lea.vmem %s1892_s1, %s1316_s9  ;;  %s1451_s17 = smul.u32 3, %s1919_s13 }
  0x23   : > { %v349_v7 = vrot.slane %v333_v4, 1  ;;  %v350_v8 = vrot.slane %v334_v5, 1  ;;  %v352_v9 = vrot.slane %v335_v6, 1  ;;  %v336_v12 = vld [vmem:[%s320_s29] sm:$0xff]  ;;  %v337_v13 = vld [vmem:[%s320_s29 + $0x8] sm:$0xff]  ;;  %v523_v25 = vrot.slane %v333_v4, 2 }
  0x24   : > { %v338_v14 = vld [vmem:[%s320_s29 + $0x10] sm:$0x3]  ;;  %v703_v15 = vrot.slane %v336_v12, 1  ;;  %v704_v16 = vrot.slane %v337_v13, 1  ;;  %v794_v19 = vrot.slane %v336_v12, 2  ;;  %v795_v20 = vrot.slane %v337_v13, 2  ;;  %s329_s13 = sadd.s32 %s1451_s17, %s1748_s10 }
  0x25   : > { %v351_v10 = vsel %vm348_vm1, %v349_v7, %v350_v8  ;;  %v353_v11 = vsel %vm348_vm1, %v350_v8, %v352_v9  ;;  %v706_v17 = vrot.slane %v338_v14, 1  ;;  %v524_v26 = vrot.slane %v334_v5, 2  ;;  %s1317_s8 = sshll.u32 %s329_s13, 3  ;;  %s1314_s30 = sshll.u32 %s299_s26, 4 }
  0x26   : > { %1389 = vmatprep.mubr.msk.f32.mxu1 %vm354_vm2, %v351_v10  ;;  %v705_v21 = vsel %vm348_vm1, %v703_v15, %v704_v16  ;;  %v796_v23 = vsel %vm522_vm3, %v794_v19, %v795_v20  ;;  %v797_v27 = vrot.slane %v338_v14, 2  ;;  %s331_s16 = scalar_lea.vmem %s1893_s2, %s1317_s8  ;;  %v526_v31 = vrot.slane %v335_v6, 2  ;;  %s1355_s13 = sshll.u32 %s1603_s21, 1 }
  0x27   : > { %1390 = vmatmul.mubr.msk.f32.vlgmr.msra.gmra.mrb[0].mxu1 %vm354_vm2, %v353_v11  ;;  %v707_v22 = vsel %vm348_vm1, %v704_v16, %v706_v17  ;;  %1409 = vmatprep.mubr.msk.f32.mxu0 %vm354_vm2, %v705_v21  ;;  %v525_v28 = vsel %vm522_vm3, %v523_v25, %v524_v26  ;;  %v339_v32 = vld [vmem:[%s331_s16] sm:$0xff]  ;;  %v340_v34 = vld [vmem:[%s331_s16 + $0x8] sm:$0xff]  ;;  %v341_v38 = vld [vmem:[%s331_s16 + $0x10] sm:$0x3]  ;;  %s1356_s8 = sshll.u32 %s1607_s22, 5  ;;  %s301_s12 = scalar_lea.vmem [#allocation2], %s1314_s30 }
  0x28   : > { %1393 = vmatpush3.msk.msra.mxu1 %vm359_vm0, %v342_v3  ;;  %1394 = vmatprep.mubr.msk.f32.mxu1 %vm354_vm2, %v333_v4  ;;  %v798_v30 = vsel %vm522_vm3, %v795_v20, %v797_v27  ;;  %v527_v35 = vsel %vm522_vm3, %v524_v26, %v526_v31  ;;  %v974_v36 = vrot.slane %v339_v32, 1  ;;  %v975_v37 = vrot.slane %v340_v34, 1  ;;  %s1179_s27 = sadd.s32 %s1356_s8, %s1355_s13  ;;  %s1182_s29 = sshll.u32 %s301_s12, 4  ;;  %s1837_s29 = int_to_ptr.vmem [resolvable:$true] %s1182_s29 }
  0x29   : > { %1397 = vmatprep.subr.msk.mxu1 %vm359_vm0, %v1325_v18  ;;  %1410 = vmatmul.mubr.msk.f32.vlgmr.msra.gmra.mrb[0].mxu0 %vm354_vm2, %v707_v22  ;;  %v977_v41 = vrot.slane %v341_v38, 1  ;;  %v1065_v42 = vrot.slane %v339_v32, 2  ;;  %v1066_v43 = vrot.slane %v340_v34, 2  ;;  %v1068_v46 = vrot.slane %v341_v38, 2  ;;  %s1357_s10 = sshll.u32 %s1179_s27, 7  ;;  %s1839_s22 = scalar_lea.sflag [#allocation3], %s299_s26 }
  0x2a   : > { %1413 = vmatpush3.msk.msra.mxu0 %vm359_vm0, %v1337_v2  ;;  %1414 = vmatprep.mubr.msk.f32.mxu0 %vm354_vm2, %v796_v23  ;;  %v976_v39 = vsel %vm348_vm1, %v974_v36, %v975_v37  ;;  %s1835_s21 = scalar_lea.hbm %s1896_s5, %s1357_s10  ;;  %s1525_s17 = scalar_lea.vmem %s1837_s29, 256 }
  0x2b   : > { %1417 = vmatprep.subr.msk.mxu0 %vm359_vm0, %v1341_v24  ;;  %v978_v44 = vsel %vm348_vm1, %v975_v37, %v977_v41  ;;  %v1067_v45 = vsel %vm522_vm3, %v1065_v42, %v1066_v43  ;;  %v1069_v47 = vsel %vm522_vm3, %v1066_v43, %v1068_v46  ;;  %p1526_p2 = scmp.ne.s32.totalorder %s1837_s29, %s1525_s17  ;;  %s1621_s30 = smov [#allocation2]  }
  0x2c   : > { %s1529_s13 = sshll.u32 %s1621_s30, 4  ;;  %s1530_s13 = int_to_ptr.vmem [resolvable:$false] %s1529_s13 }
  0x2d   : > { %p1527_p4 = pnand %p1526_p2, %p1705_p3  ;;  %s1531_s8 = scalar_lea.vmem %s1530_s13, 512 }
  0x2e   : > { %p1532_p6 = scmp.lt.s32.totalorder %s1837_s29, %s1530_s13  ;;  %p1533_p7 = scmp.lt.s32.totalorder %s1531_s8, %s1525_s17 }
  0x2f   : > { %1395 = vmatmul.mubr.msk.f32.vlgmr.msra.gmra.mrb[0].mxu1 %vm354_vm2, %v334_v5  ;;  %p1528_p5 = pneg %p1527_p4 }
  0x30   : > { %1398 = vmatpush3.msk.msra.mxu1 %vm359_vm0, %v1325_v18  ;;  %1399 = vmatprep.mubr.msk.f32.mxu1 %vm354_vm2, %v525_v28  ;;  %p1534_p9 = por %p1533_p7, %p1532_p6 }
  0x31   : > { %1402 = vmatprep.subr.msk.mxu1 %vm359_vm0, %v1329_v29  ;;  %1415 = vmatmul.mubr.msk.f32.vlgmr.msra.gmra.mrb[0].mxu0 %vm354_vm2, %v798_v30 }
  0x32   : > { %1418 = vmatpush3.msk.msra.mxu0 %vm359_vm0, %v1341_v24  ;;  %1419 = vmatprep.mubr.msk.f32.mxu0 %vm354_vm2, %v339_v32  ;;  %p1535_p10 = pnand %p1534_p9, %p1528_p5 }
  0x33   : > { %1422 = vmatprep.subr.msk.mxu0 %vm359_vm0, %v1345_v33 }
  0x37   : > { %1400 = vmatmul.mubr.msk.f32.vlgmr.msra.gmra.mrb[0].mxu1 %vm354_vm2, %v527_v35 }
  0x38   : > { %1403 = vmatpush3.msk.msra.mxu1 %vm359_vm0, %v1329_v29  ;;  %1404 = vmatprep.mubr.msk.f32.mxu1 %vm354_vm2, %v336_v12 }
  0x39   : > { %1420 = vmatmul.mubr.msk.f32.vlgmr.msra.gmra.mrb[0].mxu0 %vm354_vm2, %v340_v34 }
  0x3a   : > { %1423 = vmatpush3.msk.msra.mxu0 %vm359_vm0, %v1345_v33  ;;  %1424 = vmatprep.mubr.msk.f32.mxu0 %vm354_vm2, %v976_v39 }
  0x3b   : > { %1427 = vmatprep.subr.msk.mxu0 %vm359_vm0, %v1349_v40 }
  0x3f   : > { %1405 = vmatmul.mubr.msk.f32.vlgmr.msra.gmra.mrb[0].mxu1 %vm354_vm2, %v337_v13 }
  0x41   : > { %1425 = vmatmul.mubr.msk.f32.vlgmr.msra.gmra.mrb[0].mxu0 %vm354_vm2, %v978_v44 }
  0x42   : > { %1428 = vmatpush3.msk.msra.mxu0 %vm359_vm0, %v1349_v40  ;;  %1429 = vmatprep.mubr.msk.f32.mxu0 %vm354_vm2, %v1067_v45 }
  0x49   : > { %1430 = vmatmul.mubr.msk.f32.vlgmr.msra.gmra.mrb[0].mxu0 %vm354_vm2, %v1069_v47 }
 0x112   : > { %v1406_v48 = vpop.f32.mrb[0].mxu1 }
 0x113   : > { %v689_v49 = vpop.f32.mrb[1].mxu1 }
 0x11c   : > { %v1431_v50 = vpop.f32.mrb[0].mxu0 }
 0x11d   : > { %v1432_v52 = vadd.f32 %v1431_v50, %v1406_v48  ;;  %v1143_v53 = vpop.f32.mrb[1].mxu0 }
 0x11e   : > { %v1433_v54 = vadd.f32 %v1143_v53, %v689_v49 }
 0x11f   : > { %v1162_v55 = vadd.f32 %v1432_v52, %v1353_v51 }
 0x120   : > { %v1161_v56 = vadd.f32 %v1433_v54, %v1353_v51 }
 0x121   : > { %1165 = vst.msk [vmem:[%s301_s12 + $0x8] sm:$0xff] %vm1163_vm4, %v1162_v55 }
 0x122   : > { %1164 = vst.msk [vmem:[%s301_s12] sm:$0xff] %vm1163_vm4, %v1161_v56 }
 0x123   : > { %1538 = shalt.err (!%p1535_p10)
}
 0x124   : > { %s1539_s26 = scalar_lea.hbm %s1835_s21, 256  ;;  %s1543_s16 = scalar_lea.hbm %s1896_s5, 8192 }
 0x125   : > { %p1540_p11 = scmp.ne.s32.totalorder %s1835_s21, %s1539_s26  ;;  %p1544_p0 = scmp.lt.u32.totalorder %s1835_s21, %s1896_s5 }
 0x126   : > { %p1545_p1 = scmp.lt.u32.totalorder %s1543_s16, %s1539_s26  ;;  %p1547_p4 = scmp.lt.u32.totalorder %s1539_s26, %s1835_s21 }
 0x127   : > { %p1541_p12 = pnand %p1540_p11, %p1705_p3 }
 0x128   : > { %p1546_p2 = por %p1545_p1, %p1544_p0 }
 0x129   : > { %p1542_p13 = pneg %p1541_p12 }
 0x12a   : > { %p1548_p5 = por %p1547_p4, %p1546_p2 }
 0x12c   : > { %p1549_p6 = pnand %p1548_p5, %p1542_p13 }
 0x12e   : > { %1552 = shalt.err (!%p1549_p6)
}
 0x12f   : > { %s1622_s14 = smov 128   ;;  %s1623_s15 = smov 8  }
 0x130   : > { %1452 = dma.vmem_to_hbm [thread:$0]  (%p1705_p3), %s1837_s29, 256, %s1835_s21, %s1839_s22, %s1622_s14, %s1622_s14, %s1623_s15  }
 0x131 PF: > { %p1458_p7 = scmp.ge.s32.totalorder %s1619_s25, 2  ;;  %s1197_s17 = sand.u32 1, %s1591_s18  }
 0x132   : > { %s1198_s30 = scalar_lea.sflag [#allocation3], %s1197_s17 }
 0x133   : > { %p1455_p9 = pnand %p1458_p7, %p1714_p8 }
 0x135   : > { %1586 = dma.done.wait (!%p1455_p9), %s1198_s30, 256  }
 0x136   : > { %1588 = vsyncadd (!%p1455_p9), %s1198_s30, 4294967040  ;;  %s18_s25 = sadd.s32 1, %s1619_s25   ;;  %s1902_s6 = sld [smem:[#allocation5_spill]] }
 0x137   : > { %p15_p10 = scmp.ge.s32.totalorder %s18_s25, 34   ;;  %s1903_s18 = smov %s1595_s19 }
 0x138   : > { %s1904_s19 = smov %s1599_s20  ;;  %s1905_s20 = smov %s1723_s11 }
 0x139   : > { %s1906_s21 = smov %s1611_s23  ;;  %s1907_s22 = smov %s1615_s24 }
 0x13a   : > { %s1908_s23 = smov %s1911_s28  ;;  %17 = sbr.rel (!%p15_p10) target bundleno = 5 (0x5), region = 89 }
 0x13c   : > { %s1909_s24 = smov %s1902_s6 }
 0x141   :  { %1203 = vsyncpa [#allocation3], 1 }
 0x142   :  { %1205 = vsyncpa [#allocation3 + $0x1], 1 }

</bundles_post_ra>
